<compile_context>
chip_gen: v7x
topology: tpu7x:2x2x1
jax: 0.10.0
libtpu: 0.0.40
codegen_flags: <defaults>
</compile_context>

<pallas_src>
import jax
import jax.numpy as jnp
import numpy as np
from jax.experimental import pallas as pl
from jax.experimental.pallas import tpu as pltpu


# ----------------------------- Pallas kernels -----------------------------

def _conv_relu_pool_kernel(w_ref, b_ref, p00_ref, p01_ref, p10_ref, p11_ref,
                           o_ref):
    """Fused conv (im2col matmul) + bias + ReLU + 2x2 max-pool.

    w_ref:   [Cout, K]     bf16  (K = Cin*k*k, torch OIHW flattening)
    b_ref:   [Cout, 1]     f32
    p*_ref:  [K, Mtile]    bf16  (one im2col slab per pool quadrant,
                                  columns ordered (b, ph, pw))
    o_ref:   [Cout, Mtile] f32   pooled + ReLU'd activations (lane-dense).
    """
    w = w_ref[...]

    def mm(p_ref):
        return jnp.dot(w, p_ref[...], preferred_element_type=jnp.float32)

    # max over the four quadrants == 2x2/stride-2 max-pool of the conv output
    # (bias is shared across quadrants and ReLU is monotone, so the order
    #  max -> +bias -> relu matches pool(relu(conv + bias))).
    y = jnp.maximum(jnp.maximum(mm(p00_ref), mm(p01_ref)),
                    jnp.maximum(mm(p10_ref), mm(p11_ref)))
    y = y + b_ref[...]                       # (Cout, 1) broadcasts over lanes
    o_ref[...] = jnp.maximum(y, 0.0).astype(o_ref.dtype)


def _mlp3_kernel(x_ref, w1_ref, b1_ref, w2_ref, b2_ref, w3_ref, b3_ref, o_ref):
    """Fused fc1+ReLU -> fc2+ReLU -> fc3.  bf16 operands, f32 accumulation."""
    h = jnp.dot(x_ref[...], w1_ref[...], preferred_element_type=jnp.float32)
    h = jnp.maximum(h + b1_ref[...], 0.0).astype(jnp.bfloat16)
    h = jnp.dot(h, w2_ref[...], preferred_element_type=jnp.float32)
    h = jnp.maximum(h + b2_ref[...], 0.0).astype(jnp.bfloat16)
    h = jnp.dot(h, w3_ref[...], preferred_element_type=jnp.float32)
    o_ref[...] = (h + b3_ref[...]).astype(o_ref.dtype)


# ------------------------------ Wrappers -----------------------------------

def _pool_quadrant_patches(x_cbhw, k):
    """im2col slabs for the four 2x2-pool quadrants.

    x_cbhw: [C, B, H, W] -> 4 arrays [C*k*k, B*Ph*Pw] (bf16); rows ordered
    (c, kh, kw) to match torch's OIHW weight flattening, columns (b, ph, pw).
    """
    # TODO(synk): move this quadrant extraction into the conv kernel (pl.ds
    # strided windows over a VMEM-resident input tile) to remove the
    # remaining XLA-side glue HBM round trip.
    C, B, H, W = x_cbhw.shape
    Ph, Pw = (H - k + 1) // 2, (W - k + 1) // 2
    M = B * Ph * Pw
    quads = []
    for dh in (0, 1):
        for dw in (0, 1):
            rows = [
                x_cbhw[:, :,
                       kh + dh: kh + dh + 2 * Ph: 2,
                       kw + dw: kw + dw + 2 * Pw: 2].reshape(C, 1, M)
                for kh in range(k) for kw in range(k)
            ]
            quads.append(
                jnp.concatenate(rows, axis=1).reshape(C * k * k, M)
                .astype(jnp.bfloat16))
    return quads, Ph, Pw


def conv_relu_pool(x_cbhw, w2d, b_col, k):
    """Fused valid conv(k, stride 1) + bias + ReLU + 2x2 max-pool.

    x_cbhw: [Cin, B, H, W] f32; w2d: [Cout, Cin*k*k] bf16; b_col: [Cout,1] f32.
    Returns [Cout, B, Ph, Pw] f32.
    """
    Cin, B, H, W = x_cbhw.shape
    Cout, K = w2d.shape
    patches, Ph, Pw = _pool_quadrant_patches(x_cbhw, k)
    M = B * Ph * Pw
    # Tile the lane (spatial) dim so large batches shard across TensorCores
    # (v7x megacore) and stay inside VMEM; at small M it is one full block.
    tm = M if M <= 512 else 512
    grid_m = pl.cdiv(M, tm)
    out = pl.pallas_call(
        _conv_relu_pool_kernel,
        out_shape=jax.ShapeDtypeStruct((Cout, M), jnp.float32),
        grid=(grid_m,),
        in_specs=[
            pl.BlockSpec((Cout, K), lambda i: (0, 0)),
            pl.BlockSpec((Cout, 1), lambda i: (0, 0)),
            pl.BlockSpec((K, tm), lambda i: (0, i)),
            pl.BlockSpec((K, tm), lambda i: (0, i)),
            pl.BlockSpec((K, tm), lambda i: (0, i)),
            pl.BlockSpec((K, tm), lambda i: (0, i)),
        ],
        out_specs=pl.BlockSpec((Cout, tm), lambda i: (0, i)),
        compiler_params=pltpu.CompilerParams(
            dimension_semantics=("parallel",)),
    )(w2d, b_col, *patches)
    return out.reshape(Cout, B, Ph, Pw)


def mlp3(x, p):
    """Fused fc1+relu -> fc2+relu -> fc3.  x: [B, 400] bf16 -> [B, 10] f32."""
    B = x.shape[0]
    args = (x,
            p["fc1_wt"], p["fc1_b"],
            p["fc2_wt"], p["fc2_b"],
            p["fc3_wt"], p["fc3_b"])
    in_specs = [pl.BlockSpec(a.shape, lambda i: (0, 0)) for a in args]
    return pl.pallas_call(
        _mlp3_kernel,
        out_shape=jax.ShapeDtypeStruct((B, 10), jnp.float32),
        grid=(1,),
        in_specs=in_specs,
        out_specs=pl.BlockSpec((B, 10), lambda i: (0, 0)),
    )(*args)


def net_forward(p, x):
    """x: [B, 3, 32, 32] f32 (NCHW, like PyTorch) -> logits [B, 10] f32."""
    B = x.shape[0]
    x = x.transpose(1, 0, 2, 3)                        # [3, B, 32, 32] (once)
    y = conv_relu_pool(x, p["w1m"], p["b1c"], 5)       # [6, B, 14, 14]
    y = conv_relu_pool(y, p["w2m"], p["b2c"], 5)       # [16, B, 5, 5]
    # torch.flatten(x, 1) orders features as (c, h, w) per batch element.
    feats = y.reshape(16, B, 25).transpose(1, 0, 2).reshape(B, 16 * 5 * 5)
    return mlp3(feats.astype(jnp.bfloat16), p)


def prepare_params(p):
    """One-time weight re-layout: flatten conv weights to [Cout, Cin*k*k],
    pre-transpose FC weights, pre-reshape biases, cast matmul operands to
    bf16 (MXU-native).  Biases stay f32 (added to the f32 accumulator)."""
    return {
        "w1m": p["w1"].reshape(6, 3 * 5 * 5).astype(jnp.bfloat16),
        "b1c": p["b1"].reshape(6, 1),
        "w2m": p["w2"].reshape(16, 6 * 5 * 5).astype(jnp.bfloat16),
        "b2c": p["b2"].reshape(16, 1),
        "fc1_wt": p["fc1_w"].T.astype(jnp.bfloat16),
        "fc1_b": p["fc1_b"].reshape(1, -1),
        "fc2_wt": p["fc2_w"].T.astype(jnp.bfloat16),
        "fc2_b": p["fc2_b"].reshape(1, -1),
        "fc3_wt": p["fc3_w"].T.astype(jnp.bfloat16),
        "fc3_b": p["fc3_b"].reshape(1, -1),
    }


# --------------------------- Reference & init -------------------------------

def net_forward_ref(p, x):
    """Pure-JAX f32 reference (matches PyTorch semantics) for verification."""
    def conv(x, w, b):
        y = jax.lax.conv_general_dilated(
            x, w, (1, 1), "VALID", dimension_numbers=("NCHW", "OIHW", "NCHW"))
        return jax.nn.relu(y + b[None, :, None, None])

    def pool(x):
        return jax.lax.reduce_window(x, -jnp.inf, jax.lax.max,
                                     (1, 1, 2, 2), (1, 1, 2, 2), "VALID")

    x = pool(conv(x, p["w1"], p["b1"]))
    x = pool(conv(x, p["w2"], p["b2"]))
    x = x.reshape(x.shape[0], -1)
    x = jax.nn.relu(x @ p["fc1_w"].T + p["fc1_b"])
    x = jax.nn.relu(x @ p["fc2_w"].T + p["fc2_b"])
    return x @ p["fc3_w"].T + p["fc3_b"]


def init_params(key):
    """Deterministic init mimicking PyTorch's U(-1/sqrt(fan_in), +1/sqrt(fan_in))."""
    def u(k, shape, fan_in):
        bound = 1.0 / float(np.sqrt(fan_in))
        return jax.random.uniform(k, shape, jnp.float32, -bound, bound)

    ks = jax.random.split(key, 10)
    return {
        "w1": u(ks[0], (6, 3, 5, 5), 3 * 25),
        "b1": u(ks[1], (6,), 3 * 25),
        "w2": u(ks[2], (16, 6, 5, 5), 6 * 25),
        "b2": u(ks[3], (16,), 6 * 25),
        "fc1_w": u(ks[4], (120, 16 * 5 * 5), 16 * 5 * 5),
        "fc1_b": u(ks[5], (120,), 16 * 5 * 5),
        "fc2_w": u(ks[6], (84, 120), 120),
        "fc2_b": u(ks[7], (84,), 120),
        "fc3_w": u(ks[8], (10, 84), 84),
        "fc3_b": u(ks[9], (10,), 84),
    }


if __name__ == "__main__":
    key = jax.random.PRNGKey(0)
    k_x, k_p = jax.random.split(key)
    # fc1 expects 16*5*5 features -> spatial input must be 32x32 (CIFAR-like).
    x = jax.random.normal(k_x, (2, 3, 32, 32), jnp.float32)
    params = init_params(k_p)
    prepared = prepare_params(params)

    fwd = jax.jit(net_forward)
    out = jax.block_until_ready(fwd(prepared, x))
    ref = jax.block_until_ready(jax.jit(net_forward_ref)(params, x))

    assert out.shape == (2, 10), out.shape
    # bf16 MXU operands vs f32 reference -> modest tolerance.
    np.testing.assert_allclose(np.asarray(out), np.asarray(ref),
                               rtol=3e-2, atol=3e-2)
    print("KERNEL_OK")
</pallas_src>

<mosaic_0001>
module attributes {stable_mosaic.version = 11 : i64} {
  func.func @_conv_relu_pool_kernel(%arg0: i32, %arg1: memref<6x75xbf16, #tpu.memory_space<vmem>>, %arg2: memref<6x1xf32, #tpu.memory_space<vmem>>, %arg3: memref<75x392xbf16, #tpu.memory_space<vmem>>, %arg4: memref<75x392xbf16, #tpu.memory_space<vmem>>, %arg5: memref<75x392xbf16, #tpu.memory_space<vmem>>, %arg6: memref<75x392xbf16, #tpu.memory_space<vmem>>, %arg7: memref<6x392xf32, #tpu.memory_space<vmem>>) attributes {dimension_semantics = [#tpu.dimension_semantics<parallel>], iteration_bounds = array<i64: 1>, scalar_prefetch = 0 : i64, scratch_operands = 0 : i64, tpu.core_type = #tpu.core_type<tc>, window_params = [{pipeline_mode = #tpu.pipeline_mode<synchronous>, transform_indices = @transform_0, window_bounds = array<i64: 6, 75>}, {pipeline_mode = #tpu.pipeline_mode<synchronous>, transform_indices = @transform_1, window_bounds = array<i64: 6, 1>}, {transform_indices = @transform_2, window_bounds = array<i64: 75, 392>}, {transform_indices = @transform_3, window_bounds = array<i64: 75, 392>}, {transform_indices = @transform_4, window_bounds = array<i64: 75, 392>}, {transform_indices = @transform_5, window_bounds = array<i64: 75, 392>}, {transform_indices = @transform_6, window_bounds = array<i64: 6, 392>}]} {
    %c0 = arith.constant 0 : index
    %c0_0 = arith.constant 0 : index
    %0 = vector.load %arg1[%c0, %c0_0] : memref<6x75xbf16, #tpu.memory_space<vmem>>, vector<6x75xbf16>
    %c0_1 = arith.constant 0 : index
    %c0_2 = arith.constant 0 : index
    %1 = vector.load %arg3[%c0_1, %c0_2] : memref<75x392xbf16, #tpu.memory_space<vmem>>, vector<75x392xbf16>
    %cst = arith.constant dense<0.000000e+00> : vector<6x392xf32>
    %2 = tpu.matmul %0, %1, %cst {dimension_numbers = #tpu.dot_dimension_numbers<[1], [0], [0], [1], [0, 0, 1, 1], [], []>} : vector<6x75xbf16>, vector<75x392xbf16>, vector<6x392xf32> -> vector<6x392xf32>
    %c0_3 = arith.constant 0 : index
    %c0_4 = arith.constant 0 : index
    %3 = vector.load %arg4[%c0_3, %c0_4] : memref<75x392xbf16, #tpu.memory_space<vmem>>, vector<75x392xbf16>
    %cst_5 = arith.constant dense<0.000000e+00> : vector<6x392xf32>
    %4 = tpu.matmul %0, %3, %cst_5 {dimension_numbers = #tpu.dot_dimension_numbers<[1], [0], [0], [1], [0, 0, 1, 1], [], []>} : vector<6x75xbf16>, vector<75x392xbf16>, vector<6x392xf32> -> vector<6x392xf32>
    %5 = arith.maximumf %2, %4 : vector<6x392xf32>
    %c0_6 = arith.constant 0 : index
    %c0_7 = arith.constant 0 : index
    %6 = vector.load %arg5[%c0_6, %c0_7] : memref<75x392xbf16, #tpu.memory_space<vmem>>, vector<75x392xbf16>
    %cst_8 = arith.constant dense<0.000000e+00> : vector<6x392xf32>
    %7 = tpu.matmul %0, %6, %cst_8 {dimension_numbers = #tpu.dot_dimension_numbers<[1], [0], [0], [1], [0, 0, 1, 1], [], []>} : vector<6x75xbf16>, vector<75x392xbf16>, vector<6x392xf32> -> vector<6x392xf32>
    %c0_9 = arith.constant 0 : index
    %c0_10 = arith.constant 0 : index
    %8 = vector.load %arg6[%c0_9, %c0_10] : memref<75x392xbf16, #tpu.memory_space<vmem>>, vector<75x392xbf16>
    %cst_11 = arith.constant dense<0.000000e+00> : vector<6x392xf32>
    %9 = tpu.matmul %0, %8, %cst_11 {dimension_numbers = #tpu.dot_dimension_numbers<[1], [0], [0], [1], [0, 0, 1, 1], [], []>} : vector<6x75xbf16>, vector<75x392xbf16>, vector<6x392xf32> -> vector<6x392xf32>
    %10 = arith.maximumf %7, %9 : vector<6x392xf32>
    %11 = arith.maximumf %5, %10 : vector<6x392xf32>
    %c0_12 = arith.constant 0 : index
    %c0_13 = arith.constant 0 : index
    %12 = vector.load %arg2[%c0_12, %c0_13] : memref<6x1xf32, #tpu.memory_space<vmem>>, vector<6x1xf32>
    %13 = vector.broadcast %12 : vector<6x1xf32> to vector<6x392xf32>
    %14 = arith.addf %11, %13 : vector<6x392xf32>
    %cst_14 = arith.constant 0.000000e+00 : f32
    %15 = vector.broadcast %cst_14 : f32 to vector<6x392xf32>
    %16 = arith.maximumf %14, %15 : vector<6x392xf32>
    %c0_15 = arith.constant 0 : index
    %c0_16 = arith.constant 0 : index
    %17 = vector.load %arg7[%c0_15, %c0_16] : memref<6x392xf32, #tpu.memory_space<vmem>>, vector<6x392xf32>
    tpu.vector_store %arg7[%c0_15, %c0_16], %16 {strides = array<i32>} : memref<6x392xf32, #tpu.memory_space<vmem>>, vector<6x392xf32>,
    return
  }
  func.func @transform_0(%arg0: i32) -> (i32, i32) {
    %c0_i32 = arith.constant 0 : i32
    %c0_i32_0 = arith.constant 0 : i32
    %c0_i32_1 = arith.constant 0 : i32
    return %c0_i32, %c0_i32_0 : i32, i32
  }
  func.func @transform_1(%arg0: i32) -> (i32, i32) {
    %c0_i32 = arith.constant 0 : i32
    %c0_i32_0 = arith.constant 0 : i32
    %c0_i32_1 = arith.constant 0 : i32
    return %c0_i32, %c0_i32_0 : i32, i32
  }
  func.func @transform_2(%arg0: i32) -> (i32, i32) {
    %c0_i32 = arith.constant 0 : i32
    %c0_i32_0 = arith.constant 0 : i32
    return %c0_i32, %arg0 : i32, i32
  }
  func.func @transform_3(%arg0: i32) -> (i32, i32) {
    %c0_i32 = arith.constant 0 : i32
    %c0_i32_0 = arith.constant 0 : i32
    return %c0_i32, %arg0 : i32, i32
  }
  func.func @transform_4(%arg0: i32) -> (i32, i32) {
    %c0_i32 = arith.constant 0 : i32
    %c0_i32_0 = arith.constant 0 : i32
    return %c0_i32, %arg0 : i32, i32
  }
  func.func @transform_5(%arg0: i32) -> (i32, i32) {
    %c0_i32 = arith.constant 0 : i32
    %c0_i32_0 = arith.constant 0 : i32
    return %c0_i32, %arg0 : i32, i32
  }
  func.func @transform_6(%arg0: i32) -> (i32, i32) {
    %c0_i32 = arith.constant 0 : i32
    %c0_i32_0 = arith.constant 0 : i32
    return %c0_i32, %arg0 : i32, i32
  }
}

module attributes {stable_mosaic.version = 11 : i64} {
  func.func @_conv_relu_pool_kernel(%arg0: i32, %arg1: memref<16x150xbf16, #tpu.memory_space<vmem>>, %arg2: memref<16x1xf32, #tpu.memory_space<vmem>>, %arg3: memref<150x50xbf16, #tpu.memory_space<vmem>>, %arg4: memref<150x50xbf16, #tpu.memory_space<vmem>>, %arg5: memref<150x50xbf16, #tpu.memory_space<vmem>>, %arg6: memref<150x50xbf16, #tpu.memory_space<vmem>>, %arg7: memref<16x50xf32, #tpu.memory_space<vmem>>) attributes {dimension_semantics = [#tpu.dimension_semantics<parallel>], iteration_bounds = array<i64: 1>, scalar_prefetch = 0 : i64, scratch_operands = 0 : i64, tpu.core_type = #tpu.core_type<tc>, window_params = [{pipeline_mode = #tpu.pipeline_mode<synchronous>, transform_indices = @transform_0, window_bounds = array<i64: 16, 150>}, {pipeline_mode = #tpu.pipeline_mode<synchronous>, transform_indices = @transform_1, window_bounds = array<i64: 16, 1>}, {transform_indices = @transform_2, window_bounds = array<i64: 150, 50>}, {transform_indices = @transform_3, window_bounds = array<i64: 150, 50>}, {transform_indices = @transform_4, window_bounds = array<i64: 150, 50>}, {transform_indices = @transform_5, window_bounds = array<i64: 150, 50>}, {transform_indices = @transform_6, window_bounds = array<i64: 16, 50>}]} {
    %c0 = arith.constant 0 : index
    %c0_0 = arith.constant 0 : index
    %0 = vector.load %arg1[%c0, %c0_0] : memref<16x150xbf16, #tpu.memory_space<vmem>>, vector<16x150xbf16>
    %c0_1 = arith.constant 0 : index
    %c0_2 = arith.constant 0 : index
    %1 = vector.load %arg3[%c0_1, %c0_2] : memref<150x50xbf16, #tpu.memory_space<vmem>>, vector<150x50xbf16>
    %cst = arith.constant dense<0.000000e+00> : vector<16x50xf32>
    %2 = tpu.matmul %0, %1, %cst {dimension_numbers = #tpu.dot_dimension_numbers<[1], [0], [0], [1], [0, 0, 1, 1], [], []>} : vector<16x150xbf16>, vector<150x50xbf16>, vector<16x50xf32> -> vector<16x50xf32>
    %c0_3 = arith.constant 0 : index
    %c0_4 = arith.constant 0 : index
    %3 = vector.load %arg4[%c0_3, %c0_4] : memref<150x50xbf16, #tpu.memory_space<vmem>>, vector<150x50xbf16>
    %cst_5 = arith.constant dense<0.000000e+00> : vector<16x50xf32>
    %4 = tpu.matmul %0, %3, %cst_5 {dimension_numbers = #tpu.dot_dimension_numbers<[1], [0], [0], [1], [0, 0, 1, 1], [], []>} : vector<16x150xbf16>, vector<150x50xbf16>, vector<16x50xf32> -> vector<16x50xf32>
    %5 = arith.maximumf %2, %4 : vector<16x50xf32>
    %c0_6 = arith.constant 0 : index
    %c0_7 = arith.constant 0 : index
    %6 = vector.load %arg5[%c0_6, %c0_7] : memref<150x50xbf16, #tpu.memory_space<vmem>>, vector<150x50xbf16>
    %cst_8 = arith.constant dense<0.000000e+00> : vector<16x50xf32>
    %7 = tpu.matmul %0, %6, %cst_8 {dimension_numbers = #tpu.dot_dimension_numbers<[1], [0], [0], [1], [0, 0, 1, 1], [], []>} : vector<16x150xbf16>, vector<150x50xbf16>, vector<16x50xf32> -> vector<16x50xf32>
    %c0_9 = arith.constant 0 : index
    %c0_10 = arith.constant 0 : index
    %8 = vector.load %arg6[%c0_9, %c0_10] : memref<150x50xbf16, #tpu.memory_space<vmem>>, vector<150x50xbf16>
    %cst_11 = arith.constant dense<0.000000e+00> : vector<16x50xf32>
    %9 = tpu.matmul %0, %8, %cst_11 {dimension_numbers = #tpu.dot_dimension_numbers<[1], [0], [0], [1], [0, 0, 1, 1], [], []>} : vector<16x150xbf16>, vector<150x50xbf16>, vector<16x50xf32> -> vector<16x50xf32>
    %10 = arith.maximumf %7, %9 : vector<16x50xf32>
    %11 = arith.maximumf %5, %10 : vector<16x50xf32>
    %c0_12 = arith.constant 0 : index
    %c0_13 = arith.constant 0 : index
    %12 = vector.load %arg2[%c0_12, %c0_13] : memref<16x1xf32, #tpu.memory_space<vmem>>, vector<16x1xf32>
    %13 = vector.broadcast %12 : vector<16x1xf32> to vector<16x50xf32>
    %14 = arith.addf %11, %13 : vector<16x50xf32>
    %cst_14 = arith.constant 0.000000e+00 : f32
    %15 = vector.broadcast %cst_14 : f32 to vector<16x50xf32>
    %16 = arith.maximumf %14, %15 : vector<16x50xf32>
    %c0_15 = arith.constant 0 : index
    %c0_16 = arith.constant 0 : index
    %17 = vector.load %arg7[%c0_15, %c0_16] : memref<16x50xf32, #tpu.memory_space<vmem>>, vector<16x50xf32>
    tpu.vector_store %arg7[%c0_15, %c0_16], %16 {strides = array<i32>} : memref<16x50xf32, #tpu.memory_space<vmem>>, vector<16x50xf32>,
    return
  }
  func.func @transform_0(%arg0: i32) -> (i32, i32) {
    %c0_i32 = arith.constant 0 : i32
    %c0_i32_0 = arith.constant 0 : i32
    %c0_i32_1 = arith.constant 0 : i32
    return %c0_i32, %c0_i32_0 : i32, i32
  }
  func.func @transform_1(%arg0: i32) -> (i32, i32) {
    %c0_i32 = arith.constant 0 : i32
    %c0_i32_0 = arith.constant 0 : i32
    %c0_i32_1 = arith.constant 0 : i32
    return %c0_i32, %c0_i32_0 : i32, i32
  }
  func.func @transform_2(%arg0: i32) -> (i32, i32) {
    %c0_i32 = arith.constant 0 : i32
    %c0_i32_0 = arith.constant 0 : i32
    return %c0_i32, %arg0 : i32, i32
  }
  func.func @transform_3(%arg0: i32) -> (i32, i32) {
    %c0_i32 = arith.constant 0 : i32
    %c0_i32_0 = arith.constant 0 : i32
    return %c0_i32, %arg0 : i32, i32
  }
  func.func @transform_4(%arg0: i32) -> (i32, i32) {
    %c0_i32 = arith.constant 0 : i32
    %c0_i32_0 = arith.constant 0 : i32
    return %c0_i32, %arg0 : i32, i32
  }
  func.func @transform_5(%arg0: i32) -> (i32, i32) {
    %c0_i32 = arith.constant 0 : i32
    %c0_i32_0 = arith.constant 0 : i32
    return %c0_i32, %arg0 : i32, i32
  }
  func.func @transform_6(%arg0: i32) -> (i32, i32) {
    %c0_i32 = arith.constant 0 : i32
    %c0_i32_0 = arith.constant 0 : i32
    return %c0_i32, %arg0 : i32, i32
  }
}

module attributes {stable_mosaic.version = 11 : i64} {
  func.func @_mlp3_kernel(%arg0: i32, %arg1: memref<2x400xbf16, #tpu.memory_space<vmem>>, %arg2: memref<400x120xbf16, #tpu.memory_space<vmem>>, %arg3: memref<1x120xf32, #tpu.memory_space<vmem>>, %arg4: memref<120x84xbf16, #tpu.memory_space<vmem>>, %arg5: memref<1x84xf32, #tpu.memory_space<vmem>>, %arg6: memref<84x10xbf16, #tpu.memory_space<vmem>>, %arg7: memref<1x10xf32, #tpu.memory_space<vmem>>, %arg8: memref<2x10xf32, #tpu.memory_space<vmem>>) attributes {dimension_semantics = [#tpu.dimension_semantics<arbitrary>], iteration_bounds = array<i64: 1>, scalar_prefetch = 0 : i64, scratch_operands = 0 : i64, tpu.core_type = #tpu.core_type<tc>, window_params = [{pipeline_mode = #tpu.pipeline_mode<synchronous>, transform_indices = @transform_0, window_bounds = array<i64: 2, 400>}, {pipeline_mode = #tpu.pipeline_mode<synchronous>, transform_indices = @transform_1, window_bounds = array<i64: 400, 120>}, {pipeline_mode = #tpu.pipeline_mode<synchronous>, transform_indices = @transform_2, window_bounds = array<i64: 1, 120>}, {pipeline_mode = #tpu.pipeline_mode<synchronous>, transform_indices = @transform_3, window_bounds = array<i64: 120, 84>}, {pipeline_mode = #tpu.pipeline_mode<synchronous>, transform_indices = @transform_4, window_bounds = array<i64: 1, 84>}, {pipeline_mode = #tpu.pipeline_mode<synchronous>, transform_indices = @transform_5, window_bounds = array<i64: 84, 10>}, {pipeline_mode = #tpu.pipeline_mode<synchronous>, transform_indices = @transform_6, window_bounds = array<i64: 1, 10>}, {pipeline_mode = #tpu.pipeline_mode<synchronous>, transform_indices = @transform_7, window_bounds = array<i64: 2, 10>}]} {
    %c0 = arith.constant 0 : index
    %c0_0 = arith.constant 0 : index
    %0 = vector.load %arg1[%c0, %c0_0] : memref<2x400xbf16, #tpu.memory_space<vmem>>, vector<2x400xbf16>
    %c0_1 = arith.constant 0 : index
    %c0_2 = arith.constant 0 : index
    %1 = vector.load %arg2[%c0_1, %c0_2] : memref<400x120xbf16, #tpu.memory_space<vmem>>, vector<400x120xbf16>
    %cst = arith.constant dense<0.000000e+00> : vector<2x120xf32>
    %2 = tpu.matmul %0, %1, %cst {dimension_numbers = #tpu.dot_dimension_numbers<[1], [0], [0], [1], [0, 0, 1, 1], [], []>} : vector<2x400xbf16>, vector<400x120xbf16>, vector<2x120xf32> -> vector<2x120xf32>
    %c0_3 = arith.constant 0 : index
    %c0_4 = arith.constant 0 : index
    %3 = vector.load %arg3[%c0_3, %c0_4] : memref<1x120xf32, #tpu.memory_space<vmem>>, vector<1x120xf32>
    %4 = vector.broadcast %3 : vector<1x120xf32> to vector<2x120xf32>
    %5 = arith.addf %2, %4 : vector<2x120xf32>
    %cst_5 = arith.constant 0.000000e+00 : f32
    %6 = vector.broadcast %cst_5 : f32 to vector<2x120xf32>
    %7 = arith.maximumf %5, %6 : vector<2x120xf32>
    %8 = arith.truncf %7 : vector<2x120xf32> to vector<2x120xbf16>
    %c0_6 = arith.constant 0 : index
    %c0_7 = arith.constant 0 : index
    %9 = vector.load %arg4[%c0_6, %c0_7] : memref<120x84xbf16, #tpu.memory_space<vmem>>, vector<120x84xbf16>
    %cst_8 = arith.constant dense<0.000000e+00> : vector<2x84xf32>
    %10 = tpu.matmul %8, %9, %cst_8 {dimension_numbers = #tpu.dot_dimension_numbers<[1], [0], [0], [1], [0, 0, 1, 1], [], []>} : vector<2x120xbf16>, vector<120x84xbf16>, vector<2x84xf32> -> vector<2x84xf32>
    %c0_9 = arith.constant 0 : index
    %c0_10 = arith.constant 0 : index
    %11 = vector.load %arg5[%c0_9, %c0_10] : memref<1x84xf32, #tpu.memory_space<vmem>>, vector<1x84xf32>
    %12 = vector.broadcast %11 : vector<1x84xf32> to vector<2x84xf32>
    %13 = arith.addf %10, %12 : vector<2x84xf32>
    %cst_11 = arith.constant 0.000000e+00 : f32
    %14 = vector.broadcast %cst_11 : f32 to vector<2x84xf32>
    %15 = arith.maximumf %13, %14 : vector<2x84xf32>
    %16 = arith.truncf %15 : vector<2x84xf32> to vector<2x84xbf16>
    %c0_12 = arith.constant 0 : index
    %c0_13 = arith.constant 0 : index
    %17 = vector.load %arg6[%c0_12, %c0_13] : memref<84x10xbf16, #tpu.memory_space<vmem>>, vector<84x10xbf16>
    %cst_14 = arith.constant dense<0.000000e+00> : vector<2x10xf32>
    %18 = tpu.matmul %16, %17, %cst_14 {dimension_numbers = #tpu.dot_dimension_numbers<[1], [0], [0], [1], [0, 0, 1, 1], [], []>} : vector<2x84xbf16>, vector<84x10xbf16>, vector<2x10xf32> -> vector<2x10xf32>
    %c0_15 = arith.constant 0 : index
    %c0_16 = arith.constant 0 : index
    %19 = vector.load %arg7[%c0_15, %c0_16] : memref<1x10xf32, #tpu.memory_space<vmem>>, vector<1x10xf32>
    %20 = vector.broadcast %19 : vector<1x10xf32> to vector<2x10xf32>
    %21 = arith.addf %18, %20 : vector<2x10xf32>
    %c0_17 = arith.constant 0 : index
    %c0_18 = arith.constant 0 : index
    %22 = vector.load %arg8[%c0_17, %c0_18] : memref<2x10xf32, #tpu.memory_space<vmem>>, vector<2x10xf32>
    tpu.vector_store %arg8[%c0_17, %c0_18], %21 {strides = array<i32>} : memref<2x10xf32, #tpu.memory_space<vmem>>, vector<2x10xf32>,
    return
  }
  func.func @transform_0(%arg0: i32) -> (i32, i32) {
    %c0_i32 = arith.constant 0 : i32
    %c0_i32_0 = arith.constant 0 : i32
    %c0_i32_1 = arith.constant 0 : i32
    return %c0_i32, %c0_i32_0 : i32, i32
  }
  func.func @transform_1(%arg0: i32) -> (i32, i32) {
    %c0_i32 = arith.constant 0 : i32
    %c0_i32_0 = arith.constant 0 : i32
    %c0_i32_1 = arith.constant 0 : i32
    return %c0_i32, %c0_i32_0 : i32, i32
  }
  func.func @transform_2(%arg0: i32) -> (i32, i32) {
    %c0_i32 = arith.constant 0 : i32
    %c0_i32_0 = arith.constant 0 : i32
    %c0_i32_1 = arith.constant 0 : i32
    return %c0_i32, %c0_i32_0 : i32, i32
  }
  func.func @transform_3(%arg0: i32) -> (i32, i32) {
    %c0_i32 = arith.constant 0 : i32
    %c0_i32_0 = arith.constant 0 : i32
    %c0_i32_1 = arith.constant 0 : i32
    return %c0_i32, %c0_i32_0 : i32, i32
  }
  func.func @transform_4(%arg0: i32) -> (i32, i32) {
    %c0_i32 = arith.constant 0 : i32
    %c0_i32_0 = arith.constant 0 : i32
    %c0_i32_1 = arith.constant 0 : i32
    return %c0_i32, %c0_i32_0 : i32, i32
  }
  func.func @transform_5(%arg0: i32) -> (i32, i32) {
    %c0_i32 = arith.constant 0 : i32
    %c0_i32_0 = arith.constant 0 : i32
    %c0_i32_1 = arith.constant 0 : i32
    return %c0_i32, %c0_i32_0 : i32, i32
  }
  func.func @transform_6(%arg0: i32) -> (i32, i32) {
    %c0_i32 = arith.constant 0 : i32
    %c0_i32_0 = arith.constant 0 : i32
    %c0_i32_1 = arith.constant 0 : i32
    return %c0_i32, %c0_i32_0 : i32, i32
  }
  func.func @transform_7(%arg0: i32) -> (i32, i32) {
    %c0_i32 = arith.constant 0 : i32
    %c0_i32_0 = arith.constant 0 : i32
    %c0_i32_1 = arith.constant 0 : i32
    return %c0_i32, %c0_i32_0 : i32, i32
  }
}

</mosaic_0001>

<bundles_post_ra>
// kernel: net_forward.3
= control target key start
LH: loop header
LB: loop body
LE: loop exit
PB: predicated region body
PF: predicated region fallthrough
CT: control target
= control target key end

     0   :  { %v1119_v1 = vmov 0   ;;  %vm145_vm0 = vcmask 1044480   ;;  %vm146_vm1 = vcmask 1045504   ;;  %v1120_v10 = vmov 65535   ;;  %s1459_s2 = inlined_call_operand.vmem [shape: bf16[75,392], index: 2, kind: input, shape index: {}]   ;;  %s1460_s3 = inlined_call_operand.vmem [shape: bf16[75,392], index: 3, kind: input, shape index: {}]   ;;  %s1461_s0 = inlined_call_operand.vmem [shape: bf16[6,75], index: 0, kind: input, shape index: {}]   ;;  %s1462_s4 = inlined_call_operand.vmem [shape: bf16[75,392], index: 4, kind: input, shape index: {}]   ;;  %s1463_s5 = inlined_call_operand.vmem [shape: bf16[75,392], index: 5, kind: input, shape index: {}]   ;;  %s1464_s1 = inlined_call_operand.vmem [shape: f32[6,1], index: 1, kind: input, shape index: {}]   ;;  %s1465_s6 = inlined_call_operand.vmem [shape: f32[6,392], index: 6, kind: output, shape index: {}]  }
   0x1   :  { %v999_v0 = vld [vmem:[%s1459_s2 + $0x4] ss:$16 sps:$4 sm:$0xff]   ;;  %193 = vmatprep.mubr.bf16.mxu0 %v1119_v1  ;;  %234 = vmatprep.mubr.bf16.mxu1 %v1119_v1  ;;  %v1001_v2 = vld [vmem:[%s1459_s2 + $0xc] ss:$16 sps:$4 sm:$0xff]   ;;  %v1003_v3 = vld [vmem:[%s1459_s2] ss:$16 sps:$4 sm:$0xff]  }
   0x2   :  { %998 = vset.pattern.permute.xlu0 %v1119_v1  ;;  %161 = vmatprep.subr.bf16.mxu0 %v999_v0  ;;  %v1004_v4 = vld [vmem:[%s1459_s2 + $0x8] ss:$16 sps:$4 sm:$0xff]   ;;  %v1005_v5 = vld [vmem:[%s1459_s2 + $0x24] ss:$16 sps:$4 sm:$0xff]   ;;  %v1007_v6 = vld [vmem:[%s1459_s2 + $0x2c] ss:$16 sps:$4 sm:$0xff]  }
   0x3   :  { %202 = vmatprep.subr.bf16.mxu1 %v1001_v2  ;;  %162 = vmatpush1.bf16.msra.mxu0 %v1003_v3  ;;  %v1009_v7 = vld [vmem:[%s1459_s2 + $0x20] ss:$16 sps:$4 sm:$0xff]   ;;  %v1010_v8 = vld [vmem:[%s1459_s2 + $0x28] ss:$16 sps:$4 sm:$0xff]   ;;  %v1011_v9 = vld [vmem:[%s1459_s2 + $0x44] ss:$16 sps:$4 sm:$0xff]  }
   0x4   :  { %203 = vmatpush1.bf16.msra.mxu1 %v1004_v4  ;;  %163 = vmatprep.subr.bf16.mxu0 %v1005_v5  ;;  %v147_v11 = vsel %vm145_vm0, 4294967295, %v1120_v10  ;;  %v1013_v12 = vld [vmem:[%s1459_s2 + $0x4c] ss:$16 sps:$4 sm:$0xff]   ;;  %v1015_v13 = vld [vmem:[%s1459_s2 + $0x40] ss:$16 sps:$4 sm:$0xff]   ;;  %vm141_vm2 = vcmask 613376  }
   0x5   :  { %204 = vmatprep.subr.bf16.mxu1 %v1007_v6  ;;  %v1016_v14 = vld [vmem:[%s1459_s2 + $0x48] ss:$16 sps:$4 sm:$0xff]   ;;  %v1017_v15 = vld [vmem:[%s1459_s2 + $0x64] ss:$16 sps:$4 sm:$0xff]   ;;  %v1019_v16 = vld [vmem:[%s1459_s2 + $0x6c] ss:$16 sps:$4 sm:$0xff]  }
   0x6   :  { %v1021_v17 = vld [vmem:[%s1459_s2 + $0x60] ss:$16 sps:$4 sm:$0xff]   ;;  %v1022_v18 = vld [vmem:[%s1459_s2 + $0x68] ss:$16 sps:$4 sm:$0xff]   ;;  %v1207_v19 = vsel %vm146_vm1, %v147_v11, 0  ;;  %vm902_vm3 = vcmask 62464  }
   0x7   :  { %164 = vmatpush1.bf16.msra.mxu0 %v1009_v7  ;;  %v1023_v20 = vld [vmem:[%s1459_s2 + $0x84] ss:$16 sps:$4 sm:$0x3f]   ;;  %v1025_v21 = vld [vmem:[%s1459_s2 + $0x8c] ss:$16 sps:$4 sm:$0x3f]  }
   0x8   :  { %205 = vmatpush1.bf16.msra.mxu1 %v1010_v8  ;;  %165 = vmatprep.subr.bf16.mxu0 %v1011_v9  ;;  %v153_v22 = vand.u32 %v1023_v20, %v1207_v19  ;;  %v1027_v23 = vld [vmem:[%s1459_s2 + $0x80] ss:$16 sps:$4 sm:$0x3f]   ;;  %v1028_v24 = vld [vmem:[%s1459_s2 + $0x88] ss:$16 sps:$4 sm:$0x3f]   ;;  %v159_v25 = vand.u32 %v1025_v21, %v1207_v19 }
   0x9   :  { %206 = vmatprep.subr.bf16.mxu1 %v1013_v12  ;;  %v150_v26 = vand.u32 %v1027_v23, %v1207_v19  ;;  %v156_v27 = vand.u32 %v1028_v24, %v1207_v19  ;;  %v1031_v28 = vld [vmem:[%s1460_s3 + $0x4] ss:$16 sps:$4 sm:$0xff]   ;;  %v1034_v29 = vld [vmem:[%s1460_s3 + $0xc] ss:$16 sps:$4 sm:$0xff]   ;;  %v1234_v30 = vld [vmem:[%s1461_s0] sm:$0x7] }
   0xa   :  { %v1029_v31 = vld [vmem:[%s1460_s3] ss:$16 sps:$4 sm:$0xff]   ;;  %v1032_v32 = vld [vmem:[%s1460_s3 + $0x8] ss:$16 sps:$4 sm:$0xff]   ;;  %v1037_v33 = vld [vmem:[%s1460_s3 + $0x24] ss:$16 sps:$4 sm:$0xff]  }
   0xb   :  { %166 = vmatpush1.bf16.msra.mxu0 %v1015_v13  ;;  %v1040_v34 = vld [vmem:[%s1460_s3 + $0x2c] ss:$16 sps:$4 sm:$0xff]   ;;  %v1035_v35 = vld [vmem:[%s1460_s3 + $0x20] ss:$16 sps:$4 sm:$0xff]   ;;  %v1038_v36 = vld [vmem:[%s1460_s3 + $0x28] ss:$16 sps:$4 sm:$0xff]  }
   0xc   :  { %207 = vmatpush1.bf16.msra.mxu1 %v1016_v14  ;;  %167 = vmatprep.subr.bf16.mxu0 %v1017_v15  ;;  %v1043_v37 = vld [vmem:[%s1460_s3 + $0x44] ss:$16 sps:$4 sm:$0xff]   ;;  %v1046_v38 = vld [vmem:[%s1460_s3 + $0x4c] ss:$16 sps:$4 sm:$0xff]   ;;  %v1041_v39 = vld [vmem:[%s1460_s3 + $0x40] ss:$16 sps:$4 sm:$0xff]  }
   0xd   :  { %208 = vmatprep.subr.bf16.mxu1 %v1019_v16  ;;  %v1044_v40 = vld [vmem:[%s1460_s3 + $0x48] ss:$16 sps:$4 sm:$0xff]   ;;  %v1049_v41 = vld [vmem:[%s1460_s3 + $0x64] ss:$16 sps:$4 sm:$0xff]   ;;  %v1052_v42 = vld [vmem:[%s1460_s3 + $0x6c] ss:$16 sps:$4 sm:$0xff]  }
   0xe   :  { %v1055_v43 = vld [vmem:[%s1460_s3 + $0x84] ss:$16 sps:$4 sm:$0x3f]   ;;  %v1058_v44 = vld [vmem:[%s1460_s3 + $0x8c] ss:$16 sps:$4 sm:$0x3f]  }
   0xf   :  { %168 = vmatpush1.bf16.msra.mxu0 %v1021_v17  ;;  %v1047_v45 = vld [vmem:[%s1460_s3 + $0x60] ss:$16 sps:$4 sm:$0xff]   ;;  %v1050_v47 = vld [vmem:[%s1460_s3 + $0x68] ss:$16 sps:$4 sm:$0xff]   ;;  %v363_v49 = vand.u32 %v1055_v43, %v1207_v19  ;;  %v369_v50 = vand.u32 %v1058_v44, %v1207_v19  ;;  %v1061_v53 = vld [vmem:[%s1462_s4 + $0x4] ss:$16 sps:$4 sm:$0xff]  }
  0x10   :  { %209 = vmatpush1.bf16.msra.mxu1 %v1022_v18  ;;  %169 = vmatprep.subr.bf16.mxu0 %v153_v22  ;;  %v1053_v46 = vld [vmem:[%s1460_s3 + $0x80] ss:$16 sps:$4 sm:$0x3f]   ;;  %v1056_v48 = vld [vmem:[%s1460_s3 + $0x88] ss:$16 sps:$4 sm:$0x3f]  }
  0x11   :  { %210 = vmatprep.subr.bf16.mxu1 %v159_v25  ;;  %v360_v51 = vand.u32 %v1053_v46, %v1207_v19  ;;  %v366_v52 = vand.u32 %v1056_v48, %v1207_v19  ;;  %v1064_v54 = vld [vmem:[%s1462_s4 + $0xc] ss:$16 sps:$4 sm:$0xff]   ;;  %v1059_v55 = vld [vmem:[%s1462_s4] ss:$16 sps:$4 sm:$0xff]   ;;  %v1062_v56 = vld [vmem:[%s1462_s4 + $0x8] ss:$16 sps:$4 sm:$0xff]  }
  0x12   :  { %v1067_v57 = vld [vmem:[%s1462_s4 + $0x24] ss:$16 sps:$4 sm:$0xff]   ;;  %v1070_v58 = vld [vmem:[%s1462_s4 + $0x2c] ss:$16 sps:$4 sm:$0xff]   ;;  %v1065_v59 = vld [vmem:[%s1462_s4 + $0x20] ss:$16 sps:$4 sm:$0xff]  }
  0x13   :  { %170 = vmatpush1.bf16.msra.mxu0 %v150_v26  ;;  %v1068_v60 = vld [vmem:[%s1462_s4 + $0x28] ss:$16 sps:$4 sm:$0xff]   ;;  %v1073_v61 = vld [vmem:[%s1462_s4 + $0x44] ss:$16 sps:$4 sm:$0xff]   ;;  %v1076_v62 = vld [vmem:[%s1462_s4 + $0x4c] ss:$16 sps:$4 sm:$0xff]  }
  0x14   :  { %211 = vmatpush1.bf16.msra.mxu1 %v156_v27  ;;  %371 = vmatprep.subr.bf16.mxu0 %v1031_v28  ;;  %v1071_v63 = vld [vmem:[%s1462_s4 + $0x40] ss:$16 sps:$4 sm:$0xff]   ;;  %v1074_v0 = vld [vmem:[%s1462_s4 + $0x48] ss:$16 sps:$4 sm:$0xff]   ;;  %v1079_v2 = vld [vmem:[%s1462_s4 + $0x64] ss:$16 sps:$4 sm:$0xff]  }
  0x15   :  { %412 = vmatprep.subr.bf16.mxu1 %v1034_v29  ;;  %v1082_v3 = vld [vmem:[%s1462_s4 + $0x6c] ss:$16 sps:$4 sm:$0xff]   ;;  %v1085_v4 = vld [vmem:[%s1462_s4 + $0x84] ss:$16 sps:$4 sm:$0x3f]  }
  0x16   :  { %928 = vmatmul.mubr.msk.bf16.vlgmr.msra.gmra.mrb[0].mxu0 %vm141_vm2, %v1234_v30  ;;  %v1088_v5 = vld [vmem:[%s1462_s4 + $0x8c] ss:$16 sps:$4 sm:$0x3f]   ;;  %v1077_v6 = vld [vmem:[%s1462_s4 + $0x60] ss:$16 sps:$4 sm:$0xff]   ;;  %v577_v10 = vand.u32 %v1085_v4, %v1207_v19 }
  0x17   :  { %929 = vmatmul.mubr.msk.bf16.vlgmr.msra.gmra.mrb[0].mxu1 %vm141_vm2, %v1234_v30  ;;  %372 = vmatpush1.bf16.msra.mxu0 %v1029_v31  ;;  %v1080_v7 = vld [vmem:[%s1462_s4 + $0x68] ss:$16 sps:$4 sm:$0xff]   ;;  %v1083_v8 = vld [vmem:[%s1462_s4 + $0x80] ss:$16 sps:$4 sm:$0x3f]   ;;  %v583_v11 = vand.u32 %v1088_v5, %v1207_v19 }
  0x18   :  { %413 = vmatpush1.bf16.msra.mxu1 %v1032_v32  ;;  %373 = vmatprep.subr.bf16.mxu0 %v1037_v33  ;;  %v1086_v9 = vld [vmem:[%s1462_s4 + $0x88] ss:$16 sps:$4 sm:$0x3f]   ;;  %v885_v12 = vld [vmem:[%s1464_s1] sm:$0x3f]  ;;  %v574_v13 = vand.u32 %v1083_v8, %v1207_v19 }
  0x19   :  { %414 = vmatprep.subr.bf16.mxu1 %v1040_v34  ;;  %403 = vmatprep.mubr.bf16.mxu0 %v1119_v1  ;;  %v580_v14 = vand.u32 %v1086_v9, %v1207_v19  ;;  %v1091_v15 = vld [vmem:[%s1463_s5 + $0x4] ss:$16 sps:$4 sm:$0xff]   ;;  %v1094_v16 = vld [vmem:[%s1463_s5 + $0xc] ss:$16 sps:$4 sm:$0xff]   ;;  %v1089_v17 = vld [vmem:[%s1463_s5] ss:$16 sps:$4 sm:$0xff]  }
  0x1a   :  { %444 = vmatprep.mubr.bf16.mxu1 %v1119_v1  ;;  %888 = vperm.xlu0 %998, %v885_v12   ;;  %v1092_v18 = vld [vmem:[%s1463_s5 + $0x8] ss:$16 sps:$4 sm:$0xff]   ;;  %v1097_v20 = vld [vmem:[%s1463_s5 + $0x24] ss:$16 sps:$4 sm:$0xff]   ;;  %v1100_v21 = vld [vmem:[%s1463_s5 + $0x2c] ss:$16 sps:$4 sm:$0xff]  }
  0x1b   :  { %374 = vmatpush1.bf16.msra.mxu0 %v1035_v35  ;;  %v1095_v22 = vld [vmem:[%s1463_s5 + $0x20] ss:$16 sps:$4 sm:$0xff]   ;;  %v1098_v23 = vld [vmem:[%s1463_s5 + $0x28] ss:$16 sps:$4 sm:$0xff]   ;;  %v1103_v24 = vld [vmem:[%s1463_s5 + $0x44] ss:$16 sps:$4 sm:$0xff]  }
  0x1c   :  { %415 = vmatpush1.bf16.msra.mxu1 %v1038_v36  ;;  %375 = vmatprep.subr.bf16.mxu0 %v1043_v37  ;;  %v1106_v25 = vld [vmem:[%s1463_s5 + $0x4c] ss:$16 sps:$4 sm:$0xff]   ;;  %v1101_v26 = vld [vmem:[%s1463_s5 + $0x40] ss:$16 sps:$4 sm:$0xff]   ;;  %v1104_v27 = vld [vmem:[%s1463_s5 + $0x48] ss:$16 sps:$4 sm:$0xff]  }
  0x1d   :  { %416 = vmatprep.subr.bf16.mxu1 %v1046_v38  ;;  %v1109_v28 = vld [vmem:[%s1463_s5 + $0x64] ss:$16 sps:$4 sm:$0xff]   ;;  %v1112_v29 = vld [vmem:[%s1463_s5 + $0x6c] ss:$16 sps:$4 sm:$0xff]   ;;  %v1107_v32 = vld [vmem:[%s1463_s5 + $0x60] ss:$16 sps:$4 sm:$0xff]  }
  0x1e   :  { %v1118_v31 = vld [vmem:[%s1463_s5 + $0x8c] ss:$16 sps:$4 sm:$0x3f]   ;;  %v1110_v33 = vld [vmem:[%s1463_s5 + $0x68] ss:$16 sps:$4 sm:$0xff]  }
  0x1f   :  { %376 = vmatpush1.bf16.msra.mxu0 %v1041_v39  ;;  %v1113_v34 = vld [vmem:[%s1463_s5 + $0x80] ss:$16 sps:$4 sm:$0x3f]   ;;  %v1116_v35 = vld [vmem:[%s1463_s5 + $0x88] ss:$16 sps:$4 sm:$0x3f]   ;;  %v793_v37 = vand.u32 %v1118_v31, %v1207_v19 }
  0x20   :  { %417 = vmatpush1.bf16.msra.mxu1 %v1044_v40  ;;  %377 = vmatprep.subr.bf16.mxu0 %v1049_v41  ;;  %v784_v38 = vand.u32 %v1113_v34, %v1207_v19  ;;  %v790_v39 = vand.u32 %v1116_v35, %v1207_v19 }
  0x21   :  { %418 = vmatprep.subr.bf16.mxu1 %v1052_v42 }
  0x23   :  { %378 = vmatpush1.bf16.msra.mxu0 %v1047_v45 }
  0x24   :  { %419 = vmatpush1.bf16.msra.mxu1 %v1050_v47  ;;  %379 = vmatprep.subr.bf16.mxu0 %v363_v49 }
  0x25   :  { %420 = vmatprep.subr.bf16.mxu1 %v369_v50 }
  0x27   :  { %380 = vmatpush1.bf16.msra.mxu0 %v360_v51 }
  0x28   :  { %421 = vmatpush1.bf16.msra.mxu1 %v366_v52  ;;  %585 = vmatprep.subr.bf16.mxu0 %v1061_v53 }
  0x29   :  { %626 = vmatprep.subr.bf16.mxu1 %v1064_v54 }
  0x2a   :  { %950 = vmatmul.mubr.msk.bf16.vlgmr.msra.gmra.mrb[4].mxu0 %vm141_vm2, %v1234_v30 }
  0x2b   :  { %951 = vmatmul.mubr.msk.bf16.vlgmr.msra.gmra.mrb[4].mxu1 %vm141_vm2, %v1234_v30  ;;  %586 = vmatpush1.bf16.msra.mxu0 %v1059_v55 }
  0x2c   :  { %627 = vmatpush1.bf16.msra.mxu1 %v1062_v56  ;;  %587 = vmatprep.subr.bf16.mxu0 %v1067_v57 }
  0x2d   :  { %628 = vmatprep.subr.bf16.mxu1 %v1070_v58  ;;  %617 = vmatprep.mubr.bf16.mxu0 %v1119_v1 }
  0x2e   :  { %658 = vmatprep.mubr.bf16.mxu1 %v1119_v1 }
  0x2f   :  { %588 = vmatpush1.bf16.msra.mxu0 %v1065_v59 }
  0x30   :  { %629 = vmatpush1.bf16.msra.mxu1 %v1068_v60  ;;  %589 = vmatprep.subr.bf16.mxu0 %v1073_v61 }
  0x31   :  { %630 = vmatprep.subr.bf16.mxu1 %v1076_v62 }
  0x33   :  { %590 = vmatpush1.bf16.msra.mxu0 %v1071_v63 }
  0x34   :  { %631 = vmatpush1.bf16.msra.mxu1 %v1074_v0  ;;  %591 = vmatprep.subr.bf16.mxu0 %v1079_v2 }
  0x35   :  { %632 = vmatprep.subr.bf16.mxu1 %v1082_v3 }
  0x37   :  { %592 = vmatpush1.bf16.msra.mxu0 %v1077_v6 }
  0x38   :  { %633 = vmatpush1.bf16.msra.mxu1 %v1080_v7  ;;  %593 = vmatprep.subr.bf16.mxu0 %v577_v10 }
  0x39   :  { %634 = vmatprep.subr.bf16.mxu1 %v583_v11 }
  0x3b   :  { %594 = vmatpush1.bf16.msra.mxu0 %v574_v13 }
  0x3c   :  { %635 = vmatpush1.bf16.msra.mxu1 %v580_v14  ;;  %795 = vmatprep.subr.bf16.mxu0 %v1091_v15 }
  0x3d   :  { %836 = vmatprep.subr.bf16.mxu1 %v1094_v16 }
  0x3e   :  { %972 = vmatmul.mubr.msk.bf16.vlgmr.msra.gmra.mrb[8].mxu0 %vm141_vm2, %v1234_v30 }
  0x3f   :  { %973 = vmatmul.mubr.msk.bf16.vlgmr.msra.gmra.mrb[8].mxu1 %vm141_vm2, %v1234_v30  ;;  %796 = vmatpush1.bf16.msra.mxu0 %v1089_v17 }
  0x40   :  { %837 = vmatpush1.bf16.msra.mxu1 %v1092_v18  ;;  %797 = vmatprep.subr.bf16.mxu0 %v1097_v20 }
  0x41   :  { %838 = vmatprep.subr.bf16.mxu1 %v1100_v21  ;;  %827 = vmatprep.mubr.bf16.mxu0 %v1119_v1 }
  0x42   :  { %868 = vmatprep.mubr.bf16.mxu1 %v1119_v1  ;;  %v1115_v1 = vld [vmem:[%s1463_s5 + $0x84] ss:$16 sps:$4 sm:$0x3f]  }
  0x43   :  { %798 = vmatpush1.bf16.msra.mxu0 %v1095_v22  ;;  %v787_v36 = vand.u32 %v1115_v1, %v1207_v19 }
  0x44   :  { %839 = vmatpush1.bf16.msra.mxu1 %v1098_v23  ;;  %799 = vmatprep.subr.bf16.mxu0 %v1103_v24 }
  0x45   :  { %840 = vmatprep.subr.bf16.mxu1 %v1106_v25 }
  0x47   :  { %800 = vmatpush1.bf16.msra.mxu0 %v1101_v26 }
  0x48   :  { %841 = vmatpush1.bf16.msra.mxu1 %v1104_v27  ;;  %801 = vmatprep.subr.bf16.mxu0 %v1109_v28 }
  0x49   :  { %842 = vmatprep.subr.bf16.mxu1 %v1112_v29 }
  0x4b   :  { %802 = vmatpush1.bf16.msra.mxu0 %v1107_v32 }
  0x4c   :  { %843 = vmatpush1.bf16.msra.mxu1 %v1110_v33  ;;  %803 = vmatprep.subr.bf16.mxu0 %v787_v36 }
  0x4d   :  { %844 = vmatprep.subr.bf16.mxu1 %v793_v37 }
  0x4f   :  { %804 = vmatpush1.bf16.msra.mxu0 %v784_v38 }
  0x50   :  { %845 = vmatpush1.bf16.msra.mxu1 %v790_v39 }
  0x52   :  { %994 = vmatmul.mubr.msk.bf16.vlgmr.msra.gmra.mrb[12].mxu0 %vm141_vm2, %v1234_v30 }
  0x53   :  { %995 = vmatmul.mubr.msk.bf16.vlgmr.msra.gmra.mrb[12].mxu1 %vm141_vm2, %v1234_v30 }
  0x99   :  { %v889_v3 = vpop.permute.xlu0 %888 }
  0xe9   :  { %v195_v40 = vpop.f32.mrb[0].mxu0 }
  0xea   :  { %v236_v41 = vpop.f32.mrb[0].mxu1  ;;  %v197_v42 = vpop.f32.mrb[1].mxu0 }
  0xeb   :  { %v238_v43 = vpop.f32.mrb[1].mxu1  ;;  %v199_v44 = vpop.f32.mrb[2].mxu0 }
  0xec   :  { %v240_v45 = vpop.f32.mrb[2].mxu1  ;;  %v200_v46 = vpop.f32.mrb[3].mxu0 }
  0xed   :  { %v241_v47 = vpop.f32.mrb[3].mxu1 }
  0xfd   :  { %v405_v48 = vpop.f32.mrb[4].mxu0 }
  0xfe   :  { %v446_v19 = vpop.f32.mrb[4].mxu1  ;;  %v453_v49 = vmax.f32 %v195_v40, %v405_v48  ;;  %v407_v51 = vpop.f32.mrb[5].mxu0 }
  0xff   :  { %v455_v50 = vmax.f32 %v236_v41, %v446_v19  ;;  %v448_v52 = vpop.f32.mrb[5].mxu1  ;;  %v454_v53 = vmax.f32 %v197_v42, %v407_v51  ;;  %v409_v55 = vpop.f32.mrb[6].mxu0 }
 0x100   :  { %v456_v54 = vmax.f32 %v238_v43, %v448_v52  ;;  %v450_v56 = vpop.f32.mrb[6].mxu1  ;;  %v410_v57 = vpop.f32.mrb[7].mxu0 }
 0x101   :  { %v451_v30 = vpop.f32.mrb[7].mxu1 }
 0x111   :  { %v619_v58 = vpop.f32.mrb[8].mxu0 }
 0x112   :  { %v660_v59 = vpop.f32.mrb[8].mxu1  ;;  %v621_v60 = vpop.f32.mrb[9].mxu0 }
 0x113   :  { %v662_v61 = vpop.f32.mrb[9].mxu1  ;;  %v623_v62 = vpop.f32.mrb[10].mxu0 }
 0x114   :  { %v664_v63 = vpop.f32.mrb[10].mxu1  ;;  %v624_v0 = vpop.f32.mrb[11].mxu0 }
 0x115   :  { %v665_v2 = vpop.f32.mrb[11].mxu1 }
 0x125   :  { %v829_v4 = vpop.f32.mrb[12].mxu0 }
 0x126   :  { %v870_v5 = vpop.f32.mrb[12].mxu1  ;;  %v877_v6 = vmax.f32 %v619_v58, %v829_v4  ;;  %v831_v8 = vpop.f32.mrb[13].mxu0 }
 0x127   :  { %v879_v7 = vmax.f32 %v660_v59, %v870_v5  ;;  %v872_v9 = vpop.f32.mrb[13].mxu1  ;;  %v878_v10 = vmax.f32 %v621_v60, %v831_v8  ;;  %v833_v12 = vpop.f32.mrb[14].mxu0 }
 0x128   :  { %v880_v11 = vmax.f32 %v662_v61, %v872_v9  ;;  %v874_v13 = vpop.f32.mrb[14].mxu1  ;;  %v881_v14 = vmax.f32 %v453_v49, %v877_v6  ;;  %v834_v16 = vpop.f32.mrb[15].mxu0 }
 0x129   :  { %v883_v15 = vmax.f32 %v455_v50, %v879_v7  ;;  %v875_v17 = vpop.f32.mrb[15].mxu1  ;;  %v882_v18 = vmax.f32 %v454_v53, %v878_v10 }
 0x12a   :  { %v884_v20 = vmax.f32 %v456_v54, %v880_v11  ;;  %v891_v21 = vadd.f32 %v889_v3, %v881_v14 }
 0x12b   :  { %v893_v22 = vadd.f32 %v889_v3, %v883_v15  ;;  %v892_v23 = vadd.f32 %v889_v3, %v882_v18 }
 0x12c   :  { %v894_v24 = vadd.f32 %v889_v3, %v884_v20  ;;  %v895_v25 = vmax.f32 %v891_v21, 0.0 }
 0x12d   :  { %v897_v26 = vmax.f32 %v893_v22, 0.0  ;;  %v896_v27 = vmax.f32 %v892_v23, 0.0 }
 0x12e   :  { %v898_v28 = vmax.f32 %v894_v24, 0.0  ;;  %899 = vst [vmem:[%s1465_s6] sm:$0x3f] %v895_v25 }
 0x12f   :  { %901 = vst [vmem:[%s1465_s6 + $0x10] sm:$0x3f] %v897_v26  ;;  %900 = vst [vmem:[%s1465_s6 + $0x8] sm:$0x3f] %v896_v27 }
 0x130   :  { %903 = vst.msk [vmem:[%s1465_s6 + $0x18] sm:$0x3f] %vm902_vm3, %v898_v28 }

// kernel: net_forward.4
= control target key start
LH: loop header
LB: loop body
LE: loop exit
PB: predicated region body
PF: predicated region fallthrough
CT: control target
= control target key end

     0   :  { %v640_v0 = vmov 0   ;;  %vm111_vm0 = vcmask 179200   ;;  %vm115_vm1 = vcmask 1042432   ;;  %vm542_vm2 = vcmask 408576   ;;  %s869_s2 = inlined_call_operand.vmem [shape: bf16[150,50], index: 2, kind: input, shape index: {}]   ;;  %s870_s3 = inlined_call_operand.vmem [shape: bf16[150,50], index: 3, kind: input, shape index: {}]   ;;  %s871_s0 = inlined_call_operand.vmem [shape: bf16[16,150], index: 0, kind: input, shape index: {}]   ;;  %s872_s4 = inlined_call_operand.vmem [shape: bf16[150,50], index: 4, kind: input, shape index: {}]   ;;  %s873_s5 = inlined_call_operand.vmem [shape: bf16[150,50], index: 5, kind: input, shape index: {}]   ;;  %s874_s1 = inlined_call_operand.vmem [shape: f32[16,1], index: 1, kind: input, shape index: {}]   ;;  %s875_s6 = inlined_call_operand.vmem [shape: f32[16,50], index: 6, kind: output, shape index: {}]  }
   0x1   :  { %119 = vmatprep.subr.bf16.mxu0 %v640_v0  ;;  %239 = vmatprep.subr.bf16.mxu1 %v640_v0  ;;  %v597_v1 = vld [vmem:[%s869_s2] sm:$0xff]   ;;  %v599_v3 = vld [vmem:[%s869_s2 + $0x8] sm:$0xff]   ;;  %v601_v5 = vld [vmem:[%s869_s2 + $0x10] sm:$0xff]  }
   0x2   :  { %v598_v2 = vld [vmem:[%s870_s3] sm:$0xff]   ;;  %596 = vset.pattern.permute.xlu0 %v640_v0  ;;  %120 = vmatpush1.bf16.msra.mxu0 %v597_v1  ;;  %v600_v4 = vld [vmem:[%s870_s3 + $0x8] sm:$0xff]   ;;  %v602_v6 = vld [vmem:[%s870_s3 + $0x10] sm:$0xff]  }
   0x3   :  { %240 = vmatpush1.bf16.msra.mxu1 %v598_v2  ;;  %121 = vmatprep.subr.bf16.mxu0 %v640_v0  ;;  %v603_v7 = vld [vmem:[%s869_s2 + $0x18] sm:$0xff]   ;;  %v605_v9 = vld [vmem:[%s869_s2 + $0x20] sm:$0xff]   ;;  %v607_v11 = vld [vmem:[%s869_s2 + $0x28] sm:$0xff]  }
   0x4   :  { %241 = vmatprep.subr.bf16.mxu1 %v640_v0  ;;  %v604_v8 = vld [vmem:[%s870_s3 + $0x18] sm:$0xff]   ;;  %v606_v10 = vld [vmem:[%s870_s3 + $0x20] sm:$0xff]   ;;  %v608_v12 = vld [vmem:[%s870_s3 + $0x28] sm:$0xff]  }
   0x5   :  { %v617_v13 = vld [vmem:[%s871_s0 + $0x4] ss:$8 sps:$4 sm:$0xff]   ;;  %v609_v14 = vld [vmem:[%s869_s2 + $0x30] sm:$0xff]   ;;  %v611_v16 = vld [vmem:[%s869_s2 + $0x38] sm:$0xff]  }
   0x6   :  { %122 = vmatpush1.bf16.msra.mxu0 %v599_v3  ;;  %561 = vmatprep.mubr.msk.bf16.mxu0 %vm111_vm0, %v617_v13  ;;  %v610_v15 = vld [vmem:[%s870_s3 + $0x30] sm:$0xff]   ;;  %v612_v17 = vld [vmem:[%s870_s3 + $0x38] sm:$0xff]   ;;  %v615_v18 = vld [vmem:[%s869_s2 + $0x48] ss:$0 sps:$4 sm:$0x77]  }
   0x7   :  { %242 = vmatpush1.bf16.msra.mxu1 %v600_v4  ;;  %123 = vmatprep.subr.bf16.mxu0 %v640_v0  ;;  %v613_v19 = vld [vmem:[%s869_s2 + $0x40] sm:$0xff]   ;;  %v616_v20 = vld [vmem:[%s870_s3 + $0x48] ss:$0 sps:$4 sm:$0x77]   ;;  %v117_v22 = vsel %vm115_vm1, %v615_v18, 0  ;;  %v624_v31 = vld [vmem:[%s872_s4 + $0x10] sm:$0xff]  }
   0x8   :  { %243 = vmatprep.subr.bf16.mxu1 %v640_v0  ;;  %572 = vmatprep.mubr.msk.bf16.mxu1 %vm111_vm0, %v617_v13  ;;  %v614_v21 = vld [vmem:[%s870_s3 + $0x40] sm:$0xff]   ;;  %v237_v23 = vsel %vm115_vm1, %v616_v20, 0  ;;  %v622_v28 = vld [vmem:[%s872_s4 + $0x8] sm:$0xff]   ;;  %v625_v32 = vld [vmem:[%s873_s5 + $0x10] sm:$0xff]  }
   0x9   :  { %v767_v24 = vld [vmem:[%s871_s0] ss:$8 sps:$4 sm:$0xff]   ;;  %v626_v33 = vld [vmem:[%s872_s4 + $0x18] sm:$0xff]   ;;  %v632_v39 = vld [vmem:[%s872_s4 + $0x30] sm:$0xff]  }
   0xa   :  { %124 = vmatpush1.bf16.msra.mxu0 %v601_v5  ;;  %v620_v25 = vld [vmem:[%s872_s4] sm:$0xff]   ;;  %v527_v29 = vld [vmem:[%s874_s1 + $0x8] sm:$0xff]  ;;  %v627_v34 = vld [vmem:[%s873_s5 + $0x18] sm:$0xff]  }
   0xb   :  { %244 = vmatpush1.bf16.msra.mxu1 %v602_v6  ;;  %125 = vmatprep.subr.bf16.mxu0 %v640_v0  ;;  %v621_v26 = vld [vmem:[%s873_s5] sm:$0xff]   ;;  %v623_v30 = vld [vmem:[%s873_s5 + $0x8] sm:$0xff]   ;;  %v633_v40 = vld [vmem:[%s873_s5 + $0x30] sm:$0xff]  }
   0xc   :  { %245 = vmatprep.subr.bf16.mxu1 %v640_v0  ;;  %v526_v27 = vld [vmem:[%s874_s1] sm:$0xff]  ;;  %v630_v37 = vld [vmem:[%s872_s4 + $0x28] sm:$0xff]   ;;  %v634_v41 = vld [vmem:[%s872_s4 + $0x38] sm:$0xff]  }
   0xd   :  { %530 = vperm.xlu0 %596, %v526_v27   ;;  %v628_v35 = vld [vmem:[%s872_s4 + $0x20] sm:$0xff]   ;;  %v631_v38 = vld [vmem:[%s873_s5 + $0x28] sm:$0xff]   ;;  %v635_v42 = vld [vmem:[%s873_s5 + $0x38] sm:$0xff]  }
   0xe   :  { %126 = vmatpush1.bf16.msra.mxu0 %v603_v7  ;;  %v629_v36 = vld [vmem:[%s873_s5 + $0x20] sm:$0xff]   ;;  %v638_v45 = vld [vmem:[%s872_s4 + $0x48] ss:$0 sps:$4 sm:$0x77]  }
   0xf   :  { %246 = vmatpush1.bf16.msra.mxu1 %v604_v8  ;;  %127 = vmatprep.subr.bf16.mxu0 %v640_v0  ;;  %v636_v43 = vld [vmem:[%s872_s4 + $0x40] sm:$0xff]   ;;  %v639_v46 = vld [vmem:[%s873_s5 + $0x48] ss:$0 sps:$4 sm:$0x77]   ;;  %v359_v47 = vsel %vm115_vm1, %v638_v45, 0 }
  0x10   :  { %247 = vmatprep.subr.bf16.mxu1 %v640_v0  ;;  %v637_v44 = vld [vmem:[%s873_s5 + $0x40] sm:$0xff]   ;;  %v479_v48 = vsel %vm115_vm1, %v639_v46, 0 }
  0x11   :  { %535 = vperm.xlu0 %596, %v527_v29  }
  0x12   :  { %128 = vmatpush1.bf16.msra.mxu0 %v605_v9 }
  0x13   :  { %248 = vmatpush1.bf16.msra.mxu1 %v606_v10  ;;  %129 = vmatprep.subr.bf16.mxu0 %v640_v0 }
  0x14   :  { %249 = vmatprep.subr.bf16.mxu1 %v640_v0 }
  0x16   :  { %130 = vmatpush1.bf16.msra.mxu0 %v607_v11 }
  0x17   :  { %250 = vmatpush1.bf16.msra.mxu1 %v608_v12  ;;  %131 = vmatprep.subr.bf16.mxu0 %v640_v0 }
  0x18   :  { %251 = vmatprep.subr.bf16.mxu1 %v640_v0 }
  0x1a   :  { %132 = vmatpush1.bf16.msra.mxu0 %v609_v14 }
  0x1b   :  { %252 = vmatpush1.bf16.msra.mxu1 %v610_v15  ;;  %133 = vmatprep.subr.bf16.mxu0 %v640_v0 }
  0x1c   :  { %253 = vmatprep.subr.bf16.mxu1 %v640_v0 }
  0x1e   :  { %134 = vmatpush1.bf16.msra.mxu0 %v611_v16 }
  0x1f   :  { %254 = vmatpush1.bf16.msra.mxu1 %v612_v17  ;;  %135 = vmatprep.subr.bf16.mxu0 %v640_v0 }
  0x20   :  { %255 = vmatprep.subr.bf16.mxu1 %v640_v0 }
  0x22   :  { %136 = vmatpush1.bf16.msra.mxu0 %v613_v19 }
  0x23   :  { %256 = vmatpush1.bf16.msra.mxu1 %v614_v21  ;;  %137 = vmatprep.subr.bf16.mxu0 %v640_v0 }
  0x24   :  { %257 = vmatprep.subr.bf16.mxu1 %v640_v0 }
  0x26   :  { %138 = vmatpush1.bf16.msra.mxu0 %v117_v22 }
  0x27   :  { %258 = vmatpush1.bf16.msra.mxu1 %v237_v23  ;;  %361 = vmatprep.subr.bf16.mxu0 %v640_v0 }
  0x28   :  { %481 = vmatprep.subr.bf16.mxu1 %v640_v0 }
  0x29   :  { %152 = vmatmul.mubr.bf16.vlgmr.msra.gmra.mrb[0].mxu0 %v767_v24 }
  0x2a   :  { %272 = vmatmul.mubr.bf16.vlgmr.msra.gmra.mrb[0].mxu1 %v767_v24  ;;  %362 = vmatpush1.bf16.msra.mxu0 %v620_v25 }
  0x2b   :  { %482 = vmatpush1.bf16.msra.mxu1 %v621_v26  ;;  %363 = vmatprep.subr.bf16.mxu0 %v640_v0 }
  0x2c   :  { %483 = vmatprep.subr.bf16.mxu1 %v640_v0  ;;  %583 = vmatprep.mubr.msk.bf16.mxu0 %vm111_vm0, %v617_v13 }
  0x2d   :  { %594 = vmatprep.mubr.msk.bf16.mxu1 %vm111_vm0, %v617_v13 }
  0x2e   :  { %364 = vmatpush1.bf16.msra.mxu0 %v622_v28 }
  0x2f   :  { %484 = vmatpush1.bf16.msra.mxu1 %v623_v30  ;;  %365 = vmatprep.subr.bf16.mxu0 %v640_v0 }
  0x30   :  { %485 = vmatprep.subr.bf16.mxu1 %v640_v0 }
  0x32   :  { %366 = vmatpush1.bf16.msra.mxu0 %v624_v31 }
  0x33   :  { %486 = vmatpush1.bf16.msra.mxu1 %v625_v32  ;;  %367 = vmatprep.subr.bf16.mxu0 %v640_v0 }
  0x34   :  { %487 = vmatprep.subr.bf16.mxu1 %v640_v0 }
  0x36   :  { %368 = vmatpush1.bf16.msra.mxu0 %v626_v33 }
  0x37   :  { %488 = vmatpush1.bf16.msra.mxu1 %v627_v34  ;;  %369 = vmatprep.subr.bf16.mxu0 %v640_v0 }
  0x38   :  { %489 = vmatprep.subr.bf16.mxu1 %v640_v0 }
  0x3a   :  { %370 = vmatpush1.bf16.msra.mxu0 %v628_v35 }
  0x3b   :  { %490 = vmatpush1.bf16.msra.mxu1 %v629_v36  ;;  %371 = vmatprep.subr.bf16.mxu0 %v640_v0 }
  0x3c   :  { %491 = vmatprep.subr.bf16.mxu1 %v640_v0 }
  0x3e   :  { %372 = vmatpush1.bf16.msra.mxu0 %v630_v37 }
  0x3f   :  { %492 = vmatpush1.bf16.msra.mxu1 %v631_v38  ;;  %373 = vmatprep.subr.bf16.mxu0 %v640_v0 }
  0x40   :  { %493 = vmatprep.subr.bf16.mxu1 %v640_v0 }
  0x42   :  { %374 = vmatpush1.bf16.msra.mxu0 %v632_v39 }
  0x43   :  { %494 = vmatpush1.bf16.msra.mxu1 %v633_v40  ;;  %375 = vmatprep.subr.bf16.mxu0 %v640_v0 }
  0x44   :  { %495 = vmatprep.subr.bf16.mxu1 %v640_v0 }
  0x46   :  { %376 = vmatpush1.bf16.msra.mxu0 %v634_v41 }
  0x47   :  { %496 = vmatpush1.bf16.msra.mxu1 %v635_v42  ;;  %377 = vmatprep.subr.bf16.mxu0 %v640_v0 }
  0x48   :  { %497 = vmatprep.subr.bf16.mxu1 %v640_v0 }
  0x4a   :  { %378 = vmatpush1.bf16.msra.mxu0 %v636_v43 }
  0x4b   :  { %498 = vmatpush1.bf16.msra.mxu1 %v637_v44  ;;  %379 = vmatprep.subr.bf16.mxu0 %v640_v0 }
  0x4c   :  { %499 = vmatprep.subr.bf16.mxu1 %v640_v0 }
  0x4e   :  { %380 = vmatpush1.bf16.msra.mxu0 %v359_v47 }
  0x4f   :  { %500 = vmatpush1.bf16.msra.mxu1 %v479_v48 }
  0x51   :  { %394 = vmatmul.mubr.bf16.vlgmr.msra.gmra.mrb[4].mxu0 %v767_v24 }
  0x52   :  { %514 = vmatmul.mubr.bf16.vlgmr.msra.gmra.mrb[4].mxu1 %v767_v24 }
  0x8c   :  { %v531_v59 = vpop.permute.xlu0 %530 }
  0x90   :  { %v536_v9 = vpop.permute.xlu0 %535 }
  0xfc   :  { %v153_v49 = vpop.f32.mrb[0].mxu0 }
  0xfd   :  { %v273_v50 = vpop.f32.mrb[0].mxu1  ;;  %v155_v51 = vpop.f32.mrb[1].mxu0 }
  0xfe   :  { %v280_v52 = vmax.f32 %v153_v49, %v273_v50  ;;  %v275_v53 = vpop.f32.mrb[1].mxu1  ;;  %v156_v54 = vpop.f32.mrb[2].mxu0 }
  0xff   :  { %v276_v55 = vpop.f32.mrb[2].mxu1  ;;  %v158_v56 = vpop.f32.mrb[3].mxu0 }
 0x100   :  { %v281_v57 = vmax.f32 %v156_v54, %v276_v55  ;;  %v278_v58 = vpop.f32.mrb[3].mxu1 }
 0x124   :  { %v395_v60 = vpop.f32.mrb[4].mxu0 }
 0x125   :  { %v515_v61 = vpop.f32.mrb[4].mxu1  ;;  %v397_v62 = vpop.f32.mrb[5].mxu0 }
 0x126   :  { %v522_v63 = vmax.f32 %v395_v60, %v515_v61  ;;  %v517_v0 = vpop.f32.mrb[5].mxu1  ;;  %v398_v1 = vpop.f32.mrb[6].mxu0 }
 0x127   :  { %v518_v2 = vpop.f32.mrb[6].mxu1  ;;  %v400_v3 = vpop.f32.mrb[7].mxu0 }
 0x128   :  { %v524_v4 = vmax.f32 %v280_v52, %v522_v63  ;;  %v523_v5 = vmax.f32 %v398_v1, %v518_v2  ;;  %v520_v6 = vpop.f32.mrb[7].mxu1 }
 0x12a   :  { %v538_v7 = vadd.f32 %v531_v59, %v524_v4  ;;  %v525_v8 = vmax.f32 %v281_v57, %v523_v5 }
 0x12c   :  { %v540_v10 = vmax.f32 %v538_v7, 0.0  ;;  %v539_v11 = vadd.f32 %v536_v9, %v525_v8 }
 0x12e   :  { %543 = vst.msk [vmem:[%s875_s6] sm:$0xff] %vm542_vm2, %v540_v10  ;;  %v541_v12 = vmax.f32 %v539_v11, 0.0 }
 0x130   :  { %544 = vst.msk [vmem:[%s875_s6 + $0x8] sm:$0xff] %vm542_vm2, %v541_v12 }

// kernel: net_forward.5
= control target key start
LH: loop header
LB: loop body
LE: loop exit
PB: predicated region body
PF: predicated region fallthrough
CT: control target
= control target key end

     0   :  { %v770_v1 = vmov 0   ;;  %v98_v20 = vlaneseq  ;;  %v771_v25 = vmov 1966171168   ;;  %vm264_vm0 = vcmask 130048   ;;  %s981_s0 = inlined_call_operand.vmem [shape: bf16[2,400], index: 0, kind: input, shape index: {}]   ;;  %s982_s1 = inlined_call_operand.vmem [shape: bf16[400,120], index: 1, kind: input, shape index: {}]   ;;  %s983_s2 = inlined_call_operand.vmem [shape: f32[1,120], index: 2, kind: input, shape index: {}]   ;;  %s984_s3 = inlined_call_operand.vmem [shape: bf16[120,84], index: 3, kind: input, shape index: {}]   ;;  %s985_s4 = inlined_call_operand.vmem [shape: f32[1,84], index: 4, kind: input, shape index: {}]   ;;  %s986_s5 = inlined_call_operand.vmem [shape: bf16[84,10], index: 5, kind: input, shape index: {}]   ;;  %s987_s6 = inlined_call_operand.vmem [shape: f32[1,10], index: 6, kind: input, shape index: {}]   ;;  %s988_s7 = inlined_call_operand.hbm [shape: f32[2,10], index: 7, kind: output, shape index: {}]  }
   0x1   :  { %v707_v0 = vld [vmem:[%s982_s1 + $0x40] sm:$0xff]   ;;  %308 = vmatprep.subr.bf16.mxu1 %v770_v1  ;;  %v710_v4 = vld [vmem:[%s982_s1 + $0x48] sm:$0xff]   ;;  %v713_v7 = vld [vmem:[%s982_s1 + $0x50] sm:$0xff]   ;;  %v96_v26 = vunpack.c.l.s4 %v771_v25  ;;  %v772_v38 = vmov 0.0  }
   0x2   :  { %v708_v2 = vld [vmem:[%s982_s1 + $0x80] sm:$0xff]   ;;  %628 = vmatprep.subr.bf16.mxu0 %v707_v0  ;;  %v711_v5 = vld [vmem:[%s982_s1 + $0x88] sm:$0xff]   ;;  %v714_v8 = vld [vmem:[%s982_s1 + $0x90] sm:$0xff]   ;;  %v99_v27 = vshrl.u32 %v98_v20, 7 }
   0x3   :  { %v709_v3 = vld [vmem:[%s982_s1] sm:$0xff]   ;;  %309 = vmatpush1.bf16.msra.mxu1 %v708_v2  ;;  %v712_v6 = vld [vmem:[%s982_s1 + $0x8] sm:$0xff]   ;;  %v715_v9 = vld [vmem:[%s982_s1 + $0x10] sm:$0xff]   ;;  %v97_v30 = vunpack.c.0.s8 %v96_v26 }
   0x4   :  { %629 = vmatpush3.bf16.msra.mxu0 %v709_v3  ;;  %310 = vmatprep.subr.bf16.mxu1 %v770_v1  ;;  %v716_v10 = vld [vmem:[%s982_s1 + $0x58] sm:$0xff]   ;;  %v719_v13 = vld [vmem:[%s982_s1 + $0x60] sm:$0xff]   ;;  %v722_v16 = vld [vmem:[%s982_s1 + $0x68] sm:$0xff]  }
   0x5   :  { %630 = vmatprep.subr.bf16.mxu0 %v710_v4  ;;  %v717_v11 = vld [vmem:[%s982_s1 + $0x98] sm:$0xff]   ;;  %v720_v14 = vld [vmem:[%s982_s1 + $0xa0] sm:$0xff]   ;;  %v723_v17 = vld [vmem:[%s982_s1 + $0xa8] sm:$0xff]   ;;  %v100_v32 = vsub.s32 %v97_v30, %v99_v27 }
   0x6   :  { %v718_v12 = vld [vmem:[%s982_s1 + $0x18] sm:$0xff]   ;;  %v721_v15 = vld [vmem:[%s982_s1 + $0x20] sm:$0xff]   ;;  %v724_v18 = vld [vmem:[%s982_s1 + $0x28] sm:$0xff]  }
   0x7   :  { %311 = vmatpush1.bf16.msra.mxu1 %v711_v5  ;;  %v725_v19 = vld [vmem:[%s982_s1 + $0x70] sm:$0xff]   ;;  %v583_v23 = vld.sshfl [vmem:[%s981_s0] sm:$0x33 pattern:$0x75316420]  ;;  %v728_v24 = vld [vmem:[%s982_s1 + $0x78] sm:$0xff]  }
   0x8   :  { %631 = vmatpush3.bf16.msra.mxu0 %v712_v6  ;;  %312 = vmatprep.subr.bf16.mxu1 %v770_v1  ;;  %v726_v21 = vld [vmem:[%s982_s1 + $0xb0] sm:$0xff]   ;;  %v729_v28 = vld [vmem:[%s982_s1 + $0xb8] sm:$0xff]   ;;  %v94_v29 = vcombine.high %v583_v23, %v583_v23  ;;  %v731_v33 = vld [vmem:[%s982_s1 + $0xc0] sm:$0xff]   ;;  %v101_v36 = vrot.slane %v583_v23, %v100_v32 }
   0x9   :  { %632 = vmatprep.subr.bf16.mxu0 %v713_v7  ;;  %v727_v22 = vld [vmem:[%s982_s1 + $0x30] sm:$0xff]   ;;  %v730_v31 = vld [vmem:[%s982_s1 + $0x38] sm:$0xff]   ;;  %v732_v34 = vld [vmem:[%s984_s3] sm:$0xff]  }
   0xa   :  { %v108_v35 = vrot.slane %v94_v29, %v100_v32  ;;  %v109_v39 = vcombine.high %v101_v36, %v101_v36  ;;  %v733_v40 = vld [vmem:[%s984_s3 + $0x8] sm:$0xff]  }
   0xb   :  { %313 = vmatpush1.bf16.msra.mxu1 %v714_v8 }
   0xc   :  { %633 = vmatpush3.bf16.msra.mxu0 %v715_v9  ;;  %314 = vmatprep.subr.bf16.mxu1 %v770_v1  ;;  %v110_v37 = vcombine.high %v108_v35, %v108_v35 }
   0xd   :  { %634 = vmatprep.subr.bf16.mxu0 %v716_v10  ;;  %300 = vmatprep.mubr.bf16.mxu0 %v108_v35 }
   0xe   :  { %609 = vmatprep.mubr.msk.bf16.mxu1 %vm264_vm0, %v110_v37 }
   0xf   :  { %315 = vmatpush1.bf16.msra.mxu1 %v717_v11 }
  0x10   :  { %635 = vmatpush3.bf16.msra.mxu0 %v718_v12  ;;  %316 = vmatprep.subr.bf16.mxu1 %v770_v1 }
  0x11   :  { %636 = vmatprep.subr.bf16.mxu0 %v719_v13 }
  0x13   :  { %317 = vmatpush1.bf16.msra.mxu1 %v720_v14 }
  0x14   :  { %637 = vmatpush3.bf16.msra.mxu0 %v721_v15  ;;  %318 = vmatprep.subr.bf16.mxu1 %v770_v1 }
  0x15   :  { %638 = vmatprep.subr.bf16.mxu0 %v722_v16 }
  0x17   :  { %319 = vmatpush1.bf16.msra.mxu1 %v723_v17 }
  0x18   :  { %639 = vmatpush3.bf16.msra.mxu0 %v724_v18  ;;  %320 = vmatprep.subr.bf16.mxu1 %v770_v1 }
  0x19   :  { %640 = vmatprep.subr.bf16.mxu0 %v725_v19 }
  0x1b   :  { %321 = vmatpush1.bf16.msra.mxu1 %v726_v21 }
  0x1c   :  { %641 = vmatpush3.bf16.msra.mxu0 %v727_v22  ;;  %322 = vmatprep.subr.bf16.mxu1 %v770_v1 }
  0x1d   :  { %642 = vmatprep.subr.bf16.mxu0 %v728_v24 }
  0x1f   :  { %323 = vmatpush1.bf16.msra.mxu1 %v729_v28 }
  0x20   :  { %643 = vmatpush3.bf16.msra.mxu0 %v730_v31  ;;  %324 = vmatprep.subr.bf16.mxu1 %v770_v1 }
  0x21   :  { %666 = vmatprep.subr.bf16.mxu0 %v772_v38 }
  0x23   :  { %301 = vmatmul.mubr.bf16.vlgmr.msra.gmra.mrb[0].mxu0 %v101_v36  ;;  %325 = vmatpush1.bf16.msra.mxu1 %v731_v33 }
  0x24   :  { %667 = vmatpush3.bf16.msra.mxu0 %v732_v34 }
  0x25   :  { %12 = vsyncpa [#allocation3], 0  ;;  %668 = vmatprep.subr.bf16.mxu0 %v772_v38  ;;  %686 = vmatprep.subr.bf16.mxu1 %v772_v38  ;;  %v734_v41 = vld [vmem:[%s984_s3 + $0x10] sm:$0xff]   ;;  %v735_v42 = vld [vmem:[%s984_s3 + $0x18] sm:$0xff]   ;;  %vm421_vm1 = vcmask 1043456   ;;  %vm773_vm2 = vmmov 0  }
  0x26   :  { %341 = vmatmul.mubr.bf16.vlgmr.msra.gmra.mrb[0].mxu1 %v109_v39  ;;  %v736_v43 = vld [vmem:[%s984_s3 + $0x20] sm:$0xff]   ;;  %v737_v44 = vld [vmem:[%s984_s3 + $0x28] sm:$0xff]   ;;  %v738_v45 = vld [vmem:[%s984_s3 + $0x30] sm:$0xff]   ;;  %682 = vmatprep.mubr.msk.bf16.mxu0 %vm773_vm2, %v772_v38  ;;  %vm417_vm3 = vcmask 982016   ;;  %vm522_vm4 = vcmask 1041408   ;;  %vm518_vm5 = vcmask 687104  }
  0x27   :  { %v739_v46 = vld [vmem:[%s984_s3 + $0x38] ss:$0 sps:$4 sm:$0xff]   ;;  %698 = vmatprep.mubr.msk.bf16.mxu1 %vm773_vm2, %v772_v38  ;;  %v740_v48 = vld [vmem:[%s986_s5] sm:$0xff]   ;;  %v741_v49 = vld [vmem:[%s986_s5 + $0x8] sm:$0xff]   ;;  %vm566_vm6 = vcmask 74752  }
  0x28   :  { %669 = vmatpush3.bf16.msra.mxu0 %v733_v40  ;;  %v423_v47 = vsel %vm421_vm1, %v739_v46, 0  ;;  %687 = vmatpush3.bf16.msra.mxu1 %v740_v48  ;;  %v742_v50 = vld [vmem:[%s986_s5 + $0x10] sm:$0xff]   ;;  %v743_v51 = vld [vmem:[%s986_s5 + $0x18] sm:$0xff]   ;;  %v582_v54 = vld [vmem:[%s983_s2] ss:$0 sm:$0xff] }
  0x29   :  { %670 = vmatprep.subr.bf16.mxu0 %v772_v38  ;;  %688 = vmatprep.subr.bf16.mxu1 %v772_v38  ;;  %v744_v2 = vld [vmem:[%s986_s5 + $0x20] sm:$0xff]   ;;  %v745_v3 = vld [vmem:[%s986_s5 + $0x28] ss:$0 sps:$4 sm:$0x33]   ;;  %s774_s5 = smov [#allocation2]  }
  0x2a   :  { %v524_v4 = vsel %vm522_vm4, %v745_v3, 0  ;;  %v610_v5 = vld [vmem:[%s985_s4] ss:$0 sm:$0xff]  ;;  %s574_s12 = sshll.u32 %s774_s5, 4  ;;  %s575_s12 = int_to_ptr.vmem [resolvable:$true] %s574_s12 }
  0x2b   :  { %v620_v13 = vld [vmem:[%s987_s6] ss:$0 sm:$0xff]  ;;  %s746_s4 = scalar_lea.vmem %s575_s12, 32  ;;  %p751_p1 = scmp.lt.s32.totalorder %s575_s12, %s575_s12 }
  0x2c   :  { %671 = vmatpush3.bf16.msra.mxu0 %v734_v41  ;;  %689 = vmatpush3.bf16.msra.mxu1 %v741_v49  ;;  %p747_p0 = scmp.ne.s32.totalorder %s575_s12, %s746_s4  ;;  %p752_p2 = scmp.lt.s32.totalorder %s746_s4, %s746_s4 }
  0x2d   :  { %672 = vmatprep.subr.bf16.mxu0 %v772_v38  ;;  %690 = vmatprep.subr.bf16.mxu1 %v772_v38 }
  0x2e   :  { %p753_p3 = por %p752_p2, %p751_p1 }
  0x30   :  { %673 = vmatpush3.bf16.msra.mxu0 %v735_v42  ;;  %691 = vmatpush3.bf16.msra.mxu1 %v742_v50  ;;  %p754_p4 = pnand %p753_p3, %p747_p0 }
  0x31   :  { %674 = vmatprep.subr.bf16.mxu0 %v772_v38  ;;  %692 = vmatprep.subr.bf16.mxu1 %v772_v38 }
  0x34   :  { %675 = vmatpush3.bf16.msra.mxu0 %v736_v43  ;;  %693 = vmatpush3.bf16.msra.mxu1 %v743_v51 }
  0x35   :  { %676 = vmatprep.subr.bf16.mxu0 %v772_v38  ;;  %694 = vmatprep.subr.bf16.mxu1 %v772_v38 }
  0x38   :  { %677 = vmatpush3.bf16.msra.mxu0 %v737_v44  ;;  %695 = vmatpush3.bf16.msra.mxu1 %v744_v2 }
  0x39   :  { %678 = vmatprep.subr.bf16.mxu0 %v772_v38  ;;  %696 = vmatprep.subr.bf16.mxu1 %v772_v38 }
  0x3c   :  { %679 = vmatpush3.bf16.msra.mxu0 %v738_v45  ;;  %697 = vmatpush3.bf16.msra.mxu1 %v524_v4 }
  0x3d   :  { %680 = vmatprep.subr.bf16.mxu0 %v772_v38 }
  0x40   :  { %681 = vmatpush3.bf16.msra.mxu0 %v423_v47 }
  0xf6   :  { %v644_v52 = vpop.f32.mrb[0].mxu0 }
  0xf7   :  { %v645_v53 = vpop.f32.mrb[1].mxu0 }
  0xf8   :  { %v646_v55 = vadd.f32 %v645_v53, %v644_v52  ;;  %v647_v56 = vpop.f32.mrb[2].mxu0 }
  0xf9   :  { %v648_v57 = vpop.f32.mrb[3].mxu0  ;;  %v342_v58 = vpop.f32.mrb[0].mxu1 }
  0xfa   :  { %v303_v59 = vadd.f32 %v646_v55, %v582_v54  ;;  %v344_v60 = vpop.f32.mrb[1].mxu1 }
  0xfb   :  { %v345_v61 = vpop.f32.mrb[2].mxu1 }
  0xfc   :  { %v343_v62 = vadd.f32 %v342_v58, %v303_v59  ;;  %v346_v63 = vpop.f32.mrb[3].mxu1 }
  0xfe   :  { %v348_v0 = vmax.f32 %v343_v62, 0.0 }
 0x100   :  { %v349_v1 = vpack.c.bf16 %v348_v0, %v348_v0 }
 0x102   :  { %683 = vmatmul.mubr.msk.bf16.vlgmr.msra.gmra.mrb[4].mxu0 %vm417_vm3, %v349_v1 }
 0x1d5   :  { %v459_v6 = vpop.f32.mrb[4].mxu0 }
 0x1d6   :  { %v460_v7 = vadd.f32 %v610_v5, %v459_v6  ;;  %v684_v8 = vpop.f32.mrb[5].mxu0 }
 0x1d7   :  { %v462_v9 = vpop.f32.mrb[6].mxu0 }
 0x1d8   :  { %v465_v10 = vmax.f32 %v460_v7, 0.0  ;;  %v685_v11 = vpop.f32.mrb[7].mxu0 }
 0x1da   :  { %v466_v12 = vpack.c.bf16 %v465_v10, %v465_v10 }
 0x1dc   :  { %699 = vmatmul.mubr.msk.bf16.vlgmr.msra.gmra.mrb[4].mxu1 %vm518_vm5, %v466_v12 }
 0x2af   :  { %v560_v14 = vpop.f32.mrb[4].mxu1 }
 0x2b0   :  { %v561_v15 = vadd.f32 %v620_v13, %v560_v14  ;;  %v700_v16 = vpop.f32.mrb[5].mxu1 }
 0x2b1   :  { %v563_v17 = vpop.f32.mrb[6].mxu1 }
 0x2b2   :  { %v701_v18 = vpop.f32.mrb[7].mxu1  ;;  %567 = vst.msk [vmem:[#allocation2] sm:$0x3] %vm566_vm6, %v561_v15 }
 0x2b3   :  { %757 = shalt.err (!%p754_p4)
}
 0x2b4   :  { %s758_s6 = scalar_lea.hbm %s988_s7, 32 }
 0x2b5   :  { %p759_p5 = scmp.ne.s32.totalorder %s988_s7, %s758_s6  ;;  %p762_p6 = scmp.lt.u32.totalorder %s758_s6, %s988_s7 }
 0x2b7   :  { %p764_p7 = pnand %p762_p6, %p759_p5 }
 0x2b9   :  { %767 = shalt.err (!%p764_p7)
}
 0x2ba   :  { %577 = dma.vmem_to_hbm [thread:$0]  %s575_s12, 32, %s988_s7, [#allocation3]  }
 0x2bb   :  { %768 = dma.done.wait [#allocation3], 32  }
 0x2bc   :  { %769 = vsyncadd [#allocation3], 4294967264 }
 0x2bd   :  { %581 = vsyncpa [#allocation3], 1 }

</bundles_post_ra>
